<compile_context>
chip_gen: v6e
topology: v6e:2x2x1
jax: 0.10.0
libtpu: 0.0.40
codegen_flags: <defaults>
</compile_context>

<pallas_src>
import jax
import jax.numpy as jnp
from jax.experimental import pallas as pl
from jax.experimental.pallas import tpu as pltpu

C_IN = 20
C_OUT = 256
KH = KW = 3
K = KH * KW * C_IN            # 180
K_PAD = 256                   # pad contraction dim to a full MXU-friendly 256
BN_EPS = 1e-5


def conv_bn_relu_kernel(p_ref, w_ref, shift_ref, o_ref):
    """One grid step = one (batch, row-block) tile.

    p_ref     : [1, TH, W, K_PAD]  bf16  im2col patches (zero-padded K)
    w_ref     : [K_PAD, C_OUT]     bf16  BN-scale-folded conv weights
    shift_ref : [1, C_OUT]         f32   BN shift (beta - mean*scale)
    o_ref     : [1, TH, W, C_OUT]  f32
    """
    _, th, w, cout = o_ref.shape
    k_pad = p_ref.shape[3]

    # Layout-preserving reshape (W is a multiple of 8, last dim stays 256 lanes).
    patches = p_ref[0].reshape(th * w, k_pad)

    # One fat matmul on the MXU: [TH*W, 256] @ [256, 256], f32 accumulation.
    acc = jnp.dot(patches, w_ref[...], preferred_element_type=jnp.float32)

    # Fused BN shift + ReLU (scale already folded into the weights).
    y = jnp.maximum(acc + shift_ref[...], 0.0)
    o_ref[0] = y.reshape(th, w, cout).astype(o_ref.dtype)


def _row_tile(h, w):
    """Largest divisor of H with ~128 output rows (one M tile) per grid step."""
    target = max(1, 128 // max(w, 1))
    best = 1
    for d in range(1, h + 1):
        if h % d == 0 and d <= target:
            best = d
    return best


@jax.jit
def conv_block_forward(x_nchw, w_oihw, gamma, beta, running_mean, running_var):
    """ConvBlock forward. x_nchw: [N, 20, H, W] f32 -> [N, 256, H, W] f32."""
    N, cin, H, W = x_nchw.shape
    assert cin == C_IN

    # ---- BN folding (eval mode): scale into weights, shift as (1, C_OUT) ----
    inv_std = jax.lax.rsqrt(running_var + BN_EPS)
    scale = gamma * inv_std                                        # [C_OUT]
    shift = (beta - running_mean * scale).reshape(1, C_OUT).astype(jnp.float32)

    # Matmul-ready weights: [3,3,Cin,Cout] -> [9*Cin, Cout], scale-folded,
    # K padded to 256, cast to bf16.  Row order = (kh, kw, c).
    w_hwio = jnp.transpose(w_oihw, (2, 3, 1, 0))                   # [3,3,Cin,Cout]
    w2d = (w_hwio * scale[None, None, None, :]).reshape(K, C_OUT)
    w2d = jnp.pad(w2d, ((0, K_PAD - K), (0, 0))).astype(jnp.bfloat16)

    # ---- im2col: lane-dense bf16 patches [N, H, W, K_PAD] ----
    x_nhwc = jnp.transpose(x_nchw, (0, 2, 3, 1))                   # [N, H, W, Cin]
    x_pad = jnp.pad(x_nhwc, ((0, 0), (1, 1), (1, 1), (0, 0)))      # [N, H+2, W+2, Cin]
    taps = [x_pad[:, kh:kh + H, kw:kw + W, :]
            for kh in range(KH) for kw in range(KW)]               # 9 x [N,H,W,Cin]
    patches = jnp.concatenate(taps, axis=-1)                       # [N, H, W, 180]
    patches = jnp.pad(patches, ((0, 0), (0, 0), (0, 0), (0, K_PAD - K)))
    patches = patches.astype(jnp.bfloat16)

    # ---- grid: (batch, row-block); TH*W ~ 128 rows per MXU tile ----
    TH = _row_tile(H, W)
    grid = (N, H // TH)

    out_nhwc = pl.pallas_call(
        conv_bn_relu_kernel,
        out_shape=jax.ShapeDtypeStruct((N, H, W, C_OUT), jnp.float32),
        grid_spec=pltpu.PrefetchScalarGridSpec(
            num_scalar_prefetch=0,
            grid=grid,
            in_specs=[
                pl.BlockSpec((1, TH, W, K_PAD), lambda n, h: (n, h, 0, 0)),
                pl.BlockSpec((K_PAD, C_OUT), lambda n, h: (0, 0)),   # VMEM-resident
                pl.BlockSpec((1, C_OUT), lambda n, h: (0, 0)),       # VMEM-resident
            ],
            out_specs=pl.BlockSpec((1, TH, W, C_OUT), lambda n, h: (n, h, 0, 0)),
        ),
        compiler_params=pltpu.CompilerParams(
            dimension_semantics=("parallel", "parallel"),
            # Per-step footprint (TH*W=128): 2x64 KiB bf16 in + 2x128 KiB f32 out
            # + 128 KiB weights << 48 MiB; limit chosen to stay safe on v7x.
            vmem_limit_bytes=48 * 1024 * 1024,
        ),
    )(patches, w2d, shift)

    return jnp.transpose(out_nhwc, (0, 3, 1, 2))                   # back to NCHW


def _reference(x_nchw, w_oihw, gamma, beta, running_mean, running_var):
    """Pure-JAX reference with the same bf16 operand rounding as the kernel."""
    inv_std = jax.lax.rsqrt(running_var + BN_EPS)
    scale = gamma * inv_std
    shift = beta - running_mean * scale
    w_folded = (w_oihw * scale[:, None, None, None]).astype(jnp.bfloat16)
    out = jax.lax.conv_general_dilated(
        x_nchw.astype(jnp.bfloat16).astype(jnp.float32),
        w_folded.astype(jnp.float32),
        window_strides=(1, 1), padding=((1, 1), (1, 1)),
        dimension_numbers=("NCHW", "OIHW", "NCHW"),
        precision=jax.lax.Precision.HIGHEST)
    return jnp.maximum(out + shift[None, :, None, None], 0.0)


if __name__ == "__main__":
    key = jax.random.PRNGKey(0)
    k_x, k_w, k_g, k_b, k_m, k_v = jax.random.split(key, 6)

    N, H, W = 2, 16, 16
    x = jax.random.normal(k_x, (N, C_IN, H, W), dtype=jnp.float32)

    fan_in = C_IN * KH * KW
    w = jax.random.uniform(k_w, (C_OUT, C_IN, KH, KW), dtype=jnp.float32,
                           minval=-1.0, maxval=1.0) / jnp.sqrt(fan_in)
    gamma = jax.random.uniform(k_g, (C_OUT,), jnp.float32, minval=0.5, maxval=1.5)
    beta = 0.1 * jax.random.normal(k_b, (C_OUT,), jnp.float32)
    running_mean = 0.1 * jax.random.normal(k_m, (C_OUT,), jnp.float32)
    running_var = jax.random.uniform(k_v, (C_OUT,), jnp.float32,
                                     minval=0.5, maxval=1.5)

    out = conv_block_forward(x, w, gamma, beta, running_mean, running_var)
    out = jax.block_until_ready(out)

    ref = _reference(x, w, gamma, beta, running_mean, running_var)
    assert out.shape == (N, C_OUT, H, W), out.shape
    err = jnp.max(jnp.abs(out - ref))
    assert jnp.allclose(out, ref, atol=1e-3, rtol=1e-3), f"mismatch vs reference: {err}"

    print("KERNEL_OK")
</pallas_src>

<mosaic_0001>
module attributes {stable_mosaic.version = 11 : i64} {
  func.func @conv_bn_relu_kernel(%arg0: i32, %arg1: i32, %arg2: memref<1x8x16x256xbf16, #tpu.memory_space<vmem>>, %arg3: memref<256x256xbf16, #tpu.memory_space<vmem>>, %arg4: memref<1x256xf32, #tpu.memory_space<vmem>>, %arg5: memref<1x8x16x256xf32, #tpu.memory_space<vmem>>) attributes {dimension_semantics = [#tpu.dimension_semantics<parallel>, #tpu.dimension_semantics<parallel>], iteration_bounds = array<i64: 2, 2>, scalar_prefetch = 0 : i64, scratch_operands = 0 : i64, tpu.core_type = #tpu.core_type<tc>, window_params = [{transform_indices = @transform_0, window_bounds = array<i64: 1, 8, 16, 256>}, {pipeline_mode = #tpu.pipeline_mode<synchronous>, transform_indices = @transform_1, window_bounds = array<i64: 256, 256>}, {pipeline_mode = #tpu.pipeline_mode<synchronous>, transform_indices = @transform_2, window_bounds = array<i64: 1, 256>}, {transform_indices = @transform_3, window_bounds = array<i64: 1, 8, 16, 256>}]} {
    %c0 = arith.constant 0 : index
    %c0_0 = arith.constant 0 : index
    %c0_1 = arith.constant 0 : index
    %c0_2 = arith.constant 0 : index
    %0 = vector.load %arg2[%c0, %c0_0, %c0_1, %c0_2] : memref<1x8x16x256xbf16, #tpu.memory_space<vmem>>, vector<1x8x16x256xbf16>
    %1 = vector.shape_cast %0 : vector<1x8x16x256xbf16> to vector<8x16x256xbf16>
    %2 = vector.shape_cast %1 : vector<8x16x256xbf16> to vector<128x256xbf16>
    %c0_3 = arith.constant 0 : index
    %c0_4 = arith.constant 0 : index
    %3 = vector.load %arg3[%c0_3, %c0_4] : memref<256x256xbf16, #tpu.memory_space<vmem>>, vector<256x256xbf16>
    %cst = arith.constant dense<0.000000e+00> : vector<128x256xf32>
    %4 = tpu.matmul %2, %3, %cst {dimension_numbers = #tpu.dot_dimension_numbers<[1], [0], [0], [1], [0, 0, 1, 1], [], []>} : vector<128x256xbf16>, vector<256x256xbf16>, vector<128x256xf32> -> vector<128x256xf32>
    %c0_5 = arith.constant 0 : index
    %c0_6 = arith.constant 0 : index
    %5 = vector.load %arg4[%c0_5, %c0_6] : memref<1x256xf32, #tpu.memory_space<vmem>>, vector<1x256xf32>
    %6 = vector.broadcast %5 : vector<1x256xf32> to vector<128x256xf32>
    %7 = arith.addf %4, %6 : vector<128x256xf32>
    %cst_7 = arith.constant 0.000000e+00 : f32
    %8 = vector.broadcast %cst_7 : f32 to vector<128x256xf32>
    %9 = arith.maximumf %7, %8 : vector<128x256xf32>
    %10 = vector.shape_cast %9 : vector<128x256xf32> to vector<8x16x256xf32>
    %c0_8 = arith.constant 0 : index
    %c0_9 = arith.constant 0 : index
    %c0_10 = arith.constant 0 : index
    %c0_11 = arith.constant 0 : index
    %11 = vector.load %arg5[%c0_8, %c0_9, %c0_10, %c0_11] : memref<1x8x16x256xf32, #tpu.memory_space<vmem>>, vector<1x8x16x256xf32>
    %12 = vector.shape_cast %11 : vector<1x8x16x256xf32> to vector<8x16x256xf32>
    %13 = vector.shape_cast %10 : vector<8x16x256xf32> to vector<1x8x16x256xf32>
    tpu.vector_store %arg5[%c0_8, %c0_9, %c0_10, %c0_11], %13 {strides = array<i32>} : memref<1x8x16x256xf32, #tpu.memory_space<vmem>>, vector<1x8x16x256xf32>,
    return
  }
  func.func @transform_0(%arg0: i32, %arg1: i32) -> (i32, i32, i32, i32) {
    %c0_i32 = arith.constant 0 : i32
    %c0_i32_0 = arith.constant 0 : i32
    %c0_i32_1 = arith.constant 0 : i32
    return %arg0, %arg1, %c0_i32, %c0_i32_0 : i32, i32, i32, i32
  }
  func.func @transform_1(%arg0: i32, %arg1: i32) -> (i32, i32) {
    %c0_i32 = arith.constant 0 : i32
    %c0_i32_0 = arith.constant 0 : i32
    %c0_i32_1 = arith.constant 0 : i32
    return %c0_i32, %c0_i32_0 : i32, i32
  }
  func.func @transform_2(%arg0: i32, %arg1: i32) -> (i32, i32) {
    %c0_i32 = arith.constant 0 : i32
    %c0_i32_0 = arith.constant 0 : i32
    %c0_i32_1 = arith.constant 0 : i32
    return %c0_i32, %c0_i32_0 : i32, i32
  }
  func.func @transform_3(%arg0: i32, %arg1: i32) -> (i32, i32, i32, i32) {
    %c0_i32 = arith.constant 0 : i32
    %c0_i32_0 = arith.constant 0 : i32
    %c0_i32_1 = arith.constant 0 : i32
    return %arg0, %arg1, %c0_i32, %c0_i32_0 : i32, i32, i32, i32
  }
}

</mosaic_0001>

<bundles_post_ra>
// kernel: conv_block_forward.1
= control target key start
LH: loop header
LB: loop body
LE: loop exit
PB: predicated region body
PF: predicated region fallthrough
CT: control target
= control target key end

     0   :  { %8 = vsyncpa [#allocation3], 0  ;;  %s1472_s0 = inlined_call_operand.vmem [shape: bf16[2,16,16,256], index: 0, kind: input, shape index: {}]   ;;  %s1473_s1 = inlined_call_operand.vmem [shape: bf16[256,256], index: 1, kind: input, shape index: {}]   ;;  %s1474_s2 = inlined_call_operand.vmem [shape: f32[1,256], index: 2, kind: input, shape index: {}]   ;;  %s1475_s3 = inlined_call_operand.hbm [shape: f32[2,16,16,256], index: 3, kind: output, shape index: {}]  }
   0x1   :  { %10 = vsyncpa [#allocation3 + $0x1], 0  ;;  %s1142_s12 = smov 0   ;;  %s1144_s13 = smov 0  }
   0x2   :  { %s1146_s14 = smov 0   ;;  %s1148_s15 = smov 0  }
   0x3   :  { %s1150_s16 = smov 0   ;;  %s1152_s17 = smov 0  }
   0x4   :  { %s1154_s18 = smov 0   ;;  %s1156_s19 = smov 0  }
   0x5 LB: > { %s782_s20 = sadd.s32 4294967295, %s1117_s19   ;;  %s783_s21 = sadd.s32 4294967294, %s1117_s19   ;;  %s1117_s19 = sphi %s1156_s19, %s16_s19   ;;  %s1113_s18 = sphi %s1154_s18, %s1484_s18   ;;  %s1109_s17 = sphi %s1152_s17, %s1483_s17   ;;  %s1105_s16 = sphi %s1150_s16, %s1482_s16   ;;  %s1101_s15 = sphi %s1148_s15, %s1481_s15   ;;  %s1097_s14 = sphi %s1146_s14, %s1480_s14   ;;  %s1093_s13 = sphi %s1144_s13, %s1479_s13   ;;  %s1089_s12 = sphi %s1142_s12, %s1478_s12  }
   0x6   : > { %s25_s22 = sadd.s32 1, %s1109_s17  ;;  %s28_s23 = sadd.s32 1, %s1113_s18 }
   0x7   : > { %p26_p0 = scmp.ge.s32.totalorder %s25_s22, 2  ;;  %p117_p1 = scmp.ne.s32.totalorder %s1097_s14, %s1093_s13 }
   0x8   : > { %p118_p2 = scmp.eq.s32.totalorder %s782_s20, 3  ;;  %p123_p5 = scmp.ne.s32.totalorder %s1093_s13, %s1089_s12 }
   0x9   : > { %s1486_s22 = smov (%p26_p0, %s25_s22), 0  ;;  %s1488_s23 = smov (!%p26_p0, %s28_s23), %s1113_s18 }
   0xa   : > { %s103_s24 = ssub.s32 %s1109_s17, %s1486_s22  ;;  %p1193_p3 = por %p118_p2, %p117_p1 }
   0xb   : > { %p30_p4 = scmp.ge.s32.totalorder %s1488_s23, 2  ;;  %p124_p6 = scmp.eq.s32.totalorder %s783_s21, 3 }
   0xc   : > { %p786_p7 = scmp.ge.s32.totalorder %s1117_s19, 1  ;;  %p162_p9 = scmp.lt.s32.totalorder %s1117_s19, 5 }
   0xd   : > { %s1490_s23 = smov (%p30_p4, %s1488_s23), 0  ;;  %p1202_p8 = por %p124_p6, %p123_p5 }
   0xe   : > { %s102_s27 = ssub.s32 %s1113_s18, %s1490_s23  ;;  %s107_s28 = sadd.s32 1, %s1097_s14 }
   0xf   : > { %s104_s29 = sor.u32 %s103_s24, %s102_s27  ;;  %p163_p10 = pnand %p786_p7, %p162_p9 }
  0x10   : > { %p105_p11 = scmp.eq.s32.totalorder %s104_s29, 0  ;;  %s788_s6 = sshll.u32 (!%p163_p10), %s1101_s15, 3 }
  0x11   : > { %166 = sbr.rel (%p163_p10) target bundleno = 328 (0x148), region = 32  ;;  %p192_p12 = scmp.lt.s32.totalorder (!%p163_p10), %s1105_s16, 1 }
  0x12   : > { %s1211_s30 = scalar_select %p105_p11, %s1097_s14, %s107_s28  }
  0x13   : > { %p194_p13 = scmp.lt.s32.totalorder (!%p163_p10), %s788_s6, 15  ;;  %s847_s28 = sshll.u32 (!%p163_p10), %s1101_s15, 5 }
  0x14   : > { %s1119_s10 = smov (!%p163_p10), [#allocation2]  }
  0x15   : > { %s1029_s11 = sshll.u32 (!%p163_p10), %s1119_s10, 4  ;;  %s1030_s11 = int_to_ptr.vmem [resolvable:$false] %s1029_s11 }
  0x16   : > { %v953_v0 = vld [vmem:[%s1473_s1 + $0x74] ss:$8 sps:$4 sm:$0xff]   ;;  %v955_v1 = vld [vmem:[%s1473_s1 + $0x70] ss:$8 sps:$4 sm:$0xff]   ;;  %v956_v2 = vld [vmem:[%s1473_s1 + $0x64] ss:$8 sps:$4 sm:$0xff]   ;;  %v253_v48 = vlaneseq }
  0x17   : > { %503 = vmatprep.subr.bf16.mxu0 %v953_v0  ;;  %848 = vmatprep.subr.bf16.mxu1 %v953_v0  ;;  %v958_v3 = vld [vmem:[%s1473_s1 + $0x60] ss:$8 sps:$4 sm:$0xff]   ;;  %v959_v4 = vld [vmem:[%s1473_s1 + $0x54] ss:$8 sps:$4 sm:$0xff]   ;;  %s193_s27 = scalar_select %p192_p12, %s1105_s16, 1 }
  0x18   : > { %504 = vmatpush1.bf16.msra.mxu0 %v955_v1  ;;  %864 = vmatpush1.bf16.msra.mxu1 %v955_v1  ;;  %s1492_s6 = smov (!%p194_p13, %s788_s6), 15  ;;  %v961_v5 = vld [vmem:[%s1473_s1 + $0x50] ss:$8 sps:$4 sm:$0xff]   ;;  %v962_v6 = vld [vmem:[%s1473_s1 + $0x44] ss:$8 sps:$4 sm:$0xff]   ;;  %v254_v49 = vshrl.u32 %v253_v48, 7 }
  0x19   : > { %505 = vmatprep.subr.bf16.mxu0 %v956_v2  ;;  %849 = vmatprep.subr.bf16.mxu1 %v956_v2  ;;  %s789_s7 = sshll.u32 %s1492_s6, 2  ;;  %s790_s8 = sshll.u32 %s193_s27, 6  ;;  %v964_v7 = vld [vmem:[%s1473_s1 + $0x40] ss:$8 sps:$4 sm:$0xff]   ;;  %v965_v8 = vld [vmem:[%s1473_s1 + $0x34] ss:$8 sps:$4 sm:$0xff]  }
  0x1a   : > { %s198_s21 = sadd.s32 %s790_s8, %s789_s7  ;;  %v967_v9 = vld [vmem:[%s1473_s1 + $0x30] ss:$8 sps:$4 sm:$0xff]   ;;  %v968_v10 = vld [vmem:[%s1473_s1 + $0x24] ss:$8 sps:$4 sm:$0xff]   ;;  %v970_v11 = vld [vmem:[%s1473_s1 + $0x20] ss:$8 sps:$4 sm:$0xff]  }
  0x1b   : > { %s791_s29 = sshll.u32 %s198_s21, 2  ;;  %v971_v12 = vld [vmem:[%s1473_s1 + $0x14] ss:$8 sps:$4 sm:$0xff]   ;;  %v973_v14 = vld [vmem:[%s1473_s1 + $0x10] ss:$8 sps:$4 sm:$0xff]   ;;  %v255_v50 = vsub.s32 0, %v254_v49 }
  0x1c   : > { %506 = vmatpush1.bf16.msra.mxu0 %v958_v3  ;;  %865 = vmatpush1.bf16.msra.mxu1 %v958_v3  ;;  %s1255_s9 = scalar_lea.vmem %s1472_s0, %s791_s29  ;;  %v974_v16 = vld [vmem:[%s1473_s1 + $0x4] ss:$8 sps:$4 sm:$0xff]   ;;  %v976_v17 = vld [vmem:[%s1473_s1] ss:$8 sps:$4 sm:$0xff]   ;;  %v977_v18 = vld [vmem:[%s1473_s1 + $0xf4] ss:$8 sps:$4 sm:$0xff]  }
  0x1d   : > { %507 = vmatprep.subr.bf16.mxu0 %v959_v4  ;;  %850 = vmatprep.subr.bf16.mxu1 %v959_v4  ;;  %v1003_v13 = vld [vmem:[%s1255_s9 + $0x4] ss:$8 sps:$4 sm:$0xff]   ;;  %v979_v19 = vld [vmem:[%s1473_s1 + $0xf0] ss:$8 sps:$4 sm:$0xff]   ;;  %v982_v21 = vld [vmem:[%s1473_s1 + $0xe0] ss:$8 sps:$4 sm:$0xff]  }
  0x1e   : > { %v1006_v15 = vld [vmem:[%s1255_s9 + $0x44] ss:$8 sps:$4 sm:$0xff]   ;;  %535 = vmatprep.mubr.bf16.mxu0 %v1003_v13  ;;  %v983_v22 = vld [vmem:[%s1473_s1 + $0xd4] ss:$8 sps:$4 sm:$0xff]   ;;  %v985_v23 = vld [vmem:[%s1473_s1 + $0xd0] ss:$8 sps:$4 sm:$0xff]  }
  0x1f   : > { %575 = vmatprep.mubr.bf16.mxu1 %v1006_v15  ;;  %v980_v20 = vld [vmem:[%s1473_s1 + $0xe4] ss:$8 sps:$4 sm:$0xff]   ;;  %v988_v25 = vld [vmem:[%s1473_s1 + $0xc0] ss:$8 sps:$4 sm:$0xff]   ;;  %v989_v26 = vld [vmem:[%s1473_s1 + $0xb4] ss:$8 sps:$4 sm:$0xff]  }
  0x20   : > { %508 = vmatpush1.bf16.msra.mxu0 %v961_v5  ;;  %866 = vmatpush1.bf16.msra.mxu1 %v961_v5  ;;  %v986_v24 = vld [vmem:[%s1473_s1 + $0xc4] ss:$8 sps:$4 sm:$0xff]   ;;  %v991_v27 = vld [vmem:[%s1473_s1 + $0xb0] ss:$8 sps:$4 sm:$0xff]   ;;  %v994_v29 = vld [vmem:[%s1473_s1 + $0xa0] ss:$8 sps:$4 sm:$0xff]  }
  0x21   : > { %509 = vmatprep.subr.bf16.mxu0 %v962_v6  ;;  %851 = vmatprep.subr.bf16.mxu1 %v962_v6  ;;  %v992_v28 = vld [vmem:[%s1473_s1 + $0xa4] ss:$8 sps:$4 sm:$0xff]   ;;  %v995_v30 = vld [vmem:[%s1473_s1 + $0x94] ss:$8 sps:$4 sm:$0xff]   ;;  %v997_v31 = vld [vmem:[%s1473_s1 + $0x90] ss:$8 sps:$4 sm:$0xff]  }
  0x22   : > { %v998_v32 = vld [vmem:[%s1473_s1 + $0x84] ss:$8 sps:$4 sm:$0xff]   ;;  %v1000_v33 = vld [vmem:[%s1473_s1 + $0x80] ss:$8 sps:$4 sm:$0xff]   ;;  %v1007_v36 = vld [vmem:[%s1255_s9 + $0x14] ss:$8 sps:$4 sm:$0xff]  }
  0x23   : > { %v1001_v34 = vld [vmem:[%s1255_s9] ss:$8 sps:$4 sm:$0xff]   ;;  %v1009_v37 = vld [vmem:[%s1255_s9 + $0x54] ss:$8 sps:$4 sm:$0xff]   ;;  %v1011_v38 = vld [vmem:[%s1255_s9 + $0x10] ss:$8 sps:$4 sm:$0xff]  }
  0x24   : > { %510 = vmatpush1.bf16.msra.mxu0 %v964_v7  ;;  %867 = vmatpush1.bf16.msra.mxu1 %v964_v7  ;;  %v1004_v35 = vld [vmem:[%s1255_s9 + $0x40] ss:$8 sps:$4 sm:$0xff]   ;;  %v1012_v39 = vld [vmem:[%s1255_s9 + $0x50] ss:$8 sps:$4 sm:$0xff]   ;;  %v1013_v40 = vld [vmem:[%s1255_s9 + $0x24] ss:$8 sps:$4 sm:$0xff]  }
  0x25   : > { %511 = vmatprep.subr.bf16.mxu0 %v965_v8  ;;  %852 = vmatprep.subr.bf16.mxu1 %v965_v8  ;;  %v1015_v41 = vld [vmem:[%s1255_s9 + $0x64] ss:$8 sps:$4 sm:$0xff]   ;;  %v1017_v42 = vld [vmem:[%s1255_s9 + $0x20] ss:$8 sps:$4 sm:$0xff]   ;;  %v1019_v44 = vld [vmem:[%s1255_s9 + $0x34] ss:$8 sps:$4 sm:$0xff]  }
  0x26   : > { %v1018_v43 = vld [vmem:[%s1255_s9 + $0x60] ss:$8 sps:$4 sm:$0xff]   ;;  %v1021_v45 = vld [vmem:[%s1255_s9 + $0x74] ss:$8 sps:$4 sm:$0xff]   ;;  %v1023_v46 = vld [vmem:[%s1255_s9 + $0x30] ss:$8 sps:$4 sm:$0xff]  }
  0x27   : > { %v1024_v47 = vld [vmem:[%s1255_s9 + $0x70] ss:$8 sps:$4 sm:$0xff]   ;;  %v251_v51 = vld [vmem:[%s1474_s2] sm:$0x3]  ;;  %v259_v52 = vsub.s32 1, %v254_v49  ;;  %s188_s21 = sand.u32 1, %s1093_s13  }
  0x28   : > { %512 = vmatpush1.bf16.msra.mxu0 %v967_v9  ;;  %868 = vmatpush1.bf16.msra.mxu1 %v967_v9  ;;  %v1337_v53 = vrot.slane %v251_v51, %v255_v50  ;;  %s787_s24 = sshll.u32 %s188_s21, 8  ;;  %s843_s6 = sshll.u32 %s1105_s16, 6 }
  0x29   : > { %513 = vmatprep.subr.bf16.mxu0 %v968_v10  ;;  %853 = vmatprep.subr.bf16.mxu1 %v968_v10  ;;  %v1341_v54 = vrot.slane %v251_v51, %v259_v52  ;;  %s1347_s9 = scalar_lea.vmem [#allocation2], %s787_s24  ;;  %s694_s27 = sadd.s32 %s847_s28, %s843_s6 }
  0x2a   : > { %s844_s15 = sshll.u32 %s694_s27, 7  ;;  %s697_s16 = sshll.u32 %s1347_s9, 4  ;;  %s1413_s16 = int_to_ptr.vmem [resolvable:$true] %s697_s16 }
  0x2b   : > { %s1411_s5 = scalar_lea.hbm %s1475_s3, %s844_s15  ;;  %s1421_s7 = scalar_lea.sflag [#allocation3], %s188_s21 }
  0x2c   : > { %514 = vmatpush1.bf16.msra.mxu0 %v970_v11  ;;  %869 = vmatpush1.bf16.msra.mxu1 %v970_v11  ;;  %s1025_s8 = scalar_lea.vmem %s1413_s16, 4096  ;;  %s1031_s20 = scalar_lea.vmem %s1030_s11, 8192 }
  0x2d   : > { %515 = vmatprep.subr.bf16.mxu0 %v971_v12  ;;  %854 = vmatprep.subr.bf16.mxu1 %v971_v12  ;;  %p1026_p0 = scmp.ne.s32.totalorder %s1413_s16, %s1025_s8  ;;  %p1032_p4 = scmp.lt.s32.totalorder %s1413_s16, %s1030_s11 }
  0x2e   : > { %p1033_p5 = scmp.lt.s32.totalorder %s1031_s20, %s1025_s8 }
  0x2f   : > { %p1027_p1 = pnand %p1026_p0, %p1193_p3 }
  0x30   : > { %516 = vmatpush1.bf16.msra.mxu0 %v973_v14  ;;  %870 = vmatpush1.bf16.msra.mxu1 %v973_v14  ;;  %p1034_p6 = por %p1033_p5, %p1032_p4 }
  0x31   : > { %517 = vmatprep.subr.bf16.mxu0 %v974_v16  ;;  %855 = vmatprep.subr.bf16.mxu1 %v974_v16  ;;  %p1028_p2 = pneg %p1027_p1 }
  0x33   : > { %p1035_p7 = pnand %p1034_p6, %p1028_p2 }
  0x34   : > { %518 = vmatpush1.bf16.msra.mxu0 %v976_v17  ;;  %871 = vmatpush1.bf16.msra.mxu1 %v976_v17 }
  0x35   : > { %519 = vmatprep.subr.bf16.mxu0 %v977_v18  ;;  %856 = vmatprep.subr.bf16.mxu1 %v977_v18 }
  0x38   : > { %520 = vmatpush2.bf16.msra.mxu0 %v979_v19  ;;  %872 = vmatpush2.bf16.msra.mxu1 %v979_v19 }
  0x39   : > { %521 = vmatprep.subr.bf16.mxu0 %v980_v20  ;;  %857 = vmatprep.subr.bf16.mxu1 %v980_v20 }
  0x3c   : > { %522 = vmatpush2.bf16.msra.mxu0 %v982_v21  ;;  %873 = vmatpush2.bf16.msra.mxu1 %v982_v21 }
  0x3d   : > { %523 = vmatprep.subr.bf16.mxu0 %v983_v22  ;;  %858 = vmatprep.subr.bf16.mxu1 %v983_v22 }
  0x40   : > { %524 = vmatpush2.bf16.msra.mxu0 %v985_v23  ;;  %874 = vmatpush2.bf16.msra.mxu1 %v985_v23 }
  0x41   : > { %525 = vmatprep.subr.bf16.mxu0 %v986_v24  ;;  %859 = vmatprep.subr.bf16.mxu1 %v986_v24 }
  0x44   : > { %526 = vmatpush2.bf16.msra.mxu0 %v988_v25  ;;  %875 = vmatpush2.bf16.msra.mxu1 %v988_v25 }
  0x45   : > { %527 = vmatprep.subr.bf16.mxu0 %v989_v26  ;;  %860 = vmatprep.subr.bf16.mxu1 %v989_v26 }
  0x48   : > { %528 = vmatpush2.bf16.msra.mxu0 %v991_v27  ;;  %876 = vmatpush2.bf16.msra.mxu1 %v991_v27 }
  0x49   : > { %529 = vmatprep.subr.bf16.mxu0 %v992_v28  ;;  %861 = vmatprep.subr.bf16.mxu1 %v992_v28 }
  0x4c   : > { %530 = vmatpush2.bf16.msra.mxu0 %v994_v29  ;;  %877 = vmatpush2.bf16.msra.mxu1 %v994_v29 }
  0x4d   : > { %531 = vmatprep.subr.bf16.mxu0 %v995_v30  ;;  %862 = vmatprep.subr.bf16.mxu1 %v995_v30 }
  0x50   : > { %532 = vmatpush2.bf16.msra.mxu0 %v997_v31  ;;  %878 = vmatpush2.bf16.msra.mxu1 %v997_v31 }
  0x51   : > { %533 = vmatprep.subr.bf16.mxu0 %v998_v32  ;;  %863 = vmatprep.subr.bf16.mxu1 %v998_v32 }
  0x54   : > { %534 = vmatpush2.bf16.msra.mxu0 %v1000_v33  ;;  %879 = vmatpush2.bf16.msra.mxu1 %v1000_v33 }
  0x57   : > { %536 = vmatmul.mubr.bf16.vlgmr.msra.gmra.mxu0 %v1001_v34  ;;  %576 = vmatmul.mubr.bf16.vlgmr.msra.gmra.mxu1 %v1004_v35 }
  0x58   : > { %545 = vmatprep.mubr.bf16.mxu0 %v1007_v36  ;;  %585 = vmatprep.mubr.bf16.mxu1 %v1009_v37 }
  0x5f   : > { %546 = vmatmul.mubr.bf16.gmra.mxu0 %v1011_v38  ;;  %586 = vmatmul.mubr.bf16.gmra.mxu1 %v1012_v39 }
  0x60   : > { %555 = vmatprep.mubr.bf16.mxu0 %v1013_v40  ;;  %595 = vmatprep.mubr.bf16.mxu1 %v1015_v41 }
  0x67   : > { %556 = vmatmul.mubr.bf16.gmra.mxu0 %v1017_v42  ;;  %596 = vmatmul.mubr.bf16.gmra.mxu1 %v1018_v43 }
  0x68   : > { %565 = vmatprep.mubr.bf16.mxu0 %v1019_v44  ;;  %605 = vmatprep.mubr.bf16.mxu1 %v1021_v45 }
  0x6f   : > { %566 = vmatmul.mubr.bf16.gmra.mxu0 %v1023_v46  ;;  %606 = vmatmul.mubr.bf16.gmra.mxu1 %v1024_v47 }
 0x117   : > { %v537_v55 = vpop.f32.mrf.mxu0  ;;  %v577_v56 = vpop.f32.mrf.mxu1 }
 0x118   : > { %v538_v57 = vadd.f32 %v537_v55, %v1337_v53  ;;  %v578_v58 = vadd.f32 %v577_v56, %v1337_v53 }
 0x119   : > { %v539_v59 = vpop.f32.mrf.mxu0  ;;  %v579_v60 = vpop.f32.mrf.mxu1 }
 0x11a   : > { %v616_v61 = vmax.f32 %v538_v57, 0.0  ;;  %v632_v62 = vmax.f32 %v578_v58, 0.0  ;;  %v540_v63 = vadd.f32 %v539_v59, %v1341_v54  ;;  %v580_v0 = vadd.f32 %v579_v60, %v1341_v54 }
 0x11b   : > { %v541_v1 = vpop.f32.mrf.mxu0  ;;  %v581_v2 = vpop.f32.mrf.mxu1 }
 0x11c   : > { %648 = vst [vmem:[%s1347_s9] sm:$0xff] %v616_v61  ;;  %664 = vst [vmem:[%s1347_s9 + $0x80] sm:$0xff] %v632_v62  ;;  %v617_v3 = vmax.f32 %v540_v63, 0.0  ;;  %v633_v4 = vmax.f32 %v580_v0, 0.0  ;;  %v542_v5 = vadd.f32 %v541_v1, %v1337_v53  ;;  %v582_v6 = vadd.f32 %v581_v2, %v1337_v53 }
 0x11d   : > { %v543_v7 = vpop.f32.mrf.mxu0  ;;  %v583_v8 = vpop.f32.mrf.mxu1 }
 0x11e   : > { %649 = vst [vmem:[%s1347_s9 + $0x8] sm:$0xff] %v617_v3  ;;  %665 = vst [vmem:[%s1347_s9 + $0x88] sm:$0xff] %v633_v4  ;;  %v618_v9 = vmax.f32 %v542_v5, 0.0  ;;  %v634_v10 = vmax.f32 %v582_v6, 0.0  ;;  %v544_v11 = vadd.f32 %v543_v7, %v1341_v54  ;;  %v584_v12 = vadd.f32 %v583_v8, %v1341_v54 }
 0x11f   : > { %v547_v13 = vpop.f32.mrf.mxu0  ;;  %v587_v14 = vpop.f32.mrf.mxu1 }
 0x120   : > { %650 = vst [vmem:[%s1347_s9 + $0x10] sm:$0xff] %v618_v9  ;;  %666 = vst [vmem:[%s1347_s9 + $0x90] sm:$0xff] %v634_v10  ;;  %v619_v15 = vmax.f32 %v544_v11, 0.0  ;;  %v635_v16 = vmax.f32 %v584_v12, 0.0  ;;  %v548_v17 = vadd.f32 %v547_v13, %v1337_v53  ;;  %v588_v18 = vadd.f32 %v587_v14, %v1337_v53 }
 0x121   : > { %v549_v19 = vpop.f32.mrf.mxu0  ;;  %v589_v20 = vpop.f32.mrf.mxu1 }
 0x122   : > { %651 = vst [vmem:[%s1347_s9 + $0x18] sm:$0xff] %v619_v15  ;;  %667 = vst [vmem:[%s1347_s9 + $0x98] sm:$0xff] %v635_v16  ;;  %v620_v21 = vmax.f32 %v548_v17, 0.0  ;;  %v636_v22 = vmax.f32 %v588_v18, 0.0  ;;  %v550_v23 = vadd.f32 %v549_v19, %v1341_v54  ;;  %v590_v24 = vadd.f32 %v589_v20, %v1341_v54 }
 0x123   : > { %v551_v25 = vpop.f32.mrf.mxu0  ;;  %v591_v26 = vpop.f32.mrf.mxu1 }
 0x124   : > { %652 = vst [vmem:[%s1347_s9 + $0x20] sm:$0xff] %v620_v21  ;;  %668 = vst [vmem:[%s1347_s9 + $0xa0] sm:$0xff] %v636_v22  ;;  %v621_v27 = vmax.f32 %v550_v23, 0.0  ;;  %v637_v28 = vmax.f32 %v590_v24, 0.0  ;;  %v552_v29 = vadd.f32 %v551_v25, %v1337_v53  ;;  %v592_v30 = vadd.f32 %v591_v26, %v1337_v53 }
 0x125   : > { %v553_v31 = vpop.f32.mrf.mxu0  ;;  %v593_v32 = vpop.f32.mrf.mxu1 }
 0x126   : > { %653 = vst [vmem:[%s1347_s9 + $0x28] sm:$0xff] %v621_v27  ;;  %669 = vst [vmem:[%s1347_s9 + $0xa8] sm:$0xff] %v637_v28  ;;  %v622_v33 = vmax.f32 %v552_v29, 0.0  ;;  %v638_v34 = vmax.f32 %v592_v30, 0.0  ;;  %v554_v35 = vadd.f32 %v553_v31, %v1341_v54  ;;  %v594_v36 = vadd.f32 %v593_v32, %v1341_v54 }
 0x127   : > { %v557_v37 = vpop.f32.mrf.mxu0  ;;  %v597_v38 = vpop.f32.mrf.mxu1 }
 0x128   : > { %654 = vst [vmem:[%s1347_s9 + $0x30] sm:$0xff] %v622_v33  ;;  %670 = vst [vmem:[%s1347_s9 + $0xb0] sm:$0xff] %v638_v34  ;;  %v623_v39 = vmax.f32 %v554_v35, 0.0  ;;  %v639_v40 = vmax.f32 %v594_v36, 0.0  ;;  %v558_v41 = vadd.f32 %v557_v37, %v1337_v53  ;;  %v598_v42 = vadd.f32 %v597_v38, %v1337_v53 }
 0x129   : > { %v559_v43 = vpop.f32.mrf.mxu0  ;;  %v599_v44 = vpop.f32.mrf.mxu1 }
 0x12a   : > { %655 = vst [vmem:[%s1347_s9 + $0x38] sm:$0xff] %v623_v39  ;;  %671 = vst [vmem:[%s1347_s9 + $0xb8] sm:$0xff] %v639_v40  ;;  %v624_v45 = vmax.f32 %v558_v41, 0.0  ;;  %v640_v46 = vmax.f32 %v598_v42, 0.0  ;;  %v560_v47 = vadd.f32 %v559_v43, %v1341_v54  ;;  %v600_v48 = vadd.f32 %v599_v44, %v1341_v54 }
 0x12b   : > { %v561_v49 = vpop.f32.mrf.mxu0  ;;  %v601_v50 = vpop.f32.mrf.mxu1 }
 0x12c   : > { %656 = vst [vmem:[%s1347_s9 + $0x40] sm:$0xff] %v624_v45  ;;  %672 = vst [vmem:[%s1347_s9 + $0xc0] sm:$0xff] %v640_v46  ;;  %v625_v51 = vmax.f32 %v560_v47, 0.0  ;;  %v641_v52 = vmax.f32 %v600_v48, 0.0  ;;  %v562_v55 = vadd.f32 %v561_v49, %v1337_v53  ;;  %v602_v56 = vadd.f32 %v601_v50, %v1337_v53 }
 0x12d   : > { %v563_v57 = vpop.f32.mrf.mxu0  ;;  %v603_v58 = vpop.f32.mrf.mxu1 }
 0x12e   : > { %657 = vst [vmem:[%s1347_s9 + $0x48] sm:$0xff] %v625_v51  ;;  %673 = vst [vmem:[%s1347_s9 + $0xc8] sm:$0xff] %v641_v52  ;;  %v626_v59 = vmax.f32 %v562_v55, 0.0  ;;  %v642_v60 = vmax.f32 %v602_v56, 0.0  ;;  %v564_v61 = vadd.f32 %v563_v57, %v1341_v54  ;;  %v604_v62 = vadd.f32 %v603_v58, %v1341_v54 }
 0x12f   : > { %v567_v63 = vpop.f32.mrf.mxu0  ;;  %v607_v0 = vpop.f32.mrf.mxu1 }
 0x130   : > { %658 = vst [vmem:[%s1347_s9 + $0x50] sm:$0xff] %v626_v59  ;;  %674 = vst [vmem:[%s1347_s9 + $0xd0] sm:$0xff] %v642_v60  ;;  %v627_v1 = vmax.f32 %v564_v61, 0.0  ;;  %v643_v2 = vmax.f32 %v604_v62, 0.0  ;;  %v568_v3 = vadd.f32 %v567_v63, %v1337_v53  ;;  %v608_v4 = vadd.f32 %v607_v0, %v1337_v53 }
 0x131   : > { %v569_v5 = vpop.f32.mrf.mxu0  ;;  %v609_v6 = vpop.f32.mrf.mxu1 }
 0x132   : > { %659 = vst [vmem:[%s1347_s9 + $0x58] sm:$0xff] %v627_v1  ;;  %675 = vst [vmem:[%s1347_s9 + $0xd8] sm:$0xff] %v643_v2  ;;  %v628_v7 = vmax.f32 %v568_v3, 0.0  ;;  %v644_v8 = vmax.f32 %v608_v4, 0.0  ;;  %v570_v9 = vadd.f32 %v569_v5, %v1341_v54  ;;  %v610_v10 = vadd.f32 %v609_v6, %v1341_v54 }
 0x133   : > { %v571_v11 = vpop.f32.mrf.mxu0  ;;  %v611_v12 = vpop.f32.mrf.mxu1 }
 0x134   : > { %660 = vst [vmem:[%s1347_s9 + $0x60] sm:$0xff] %v628_v7  ;;  %676 = vst [vmem:[%s1347_s9 + $0xe0] sm:$0xff] %v644_v8  ;;  %v629_v13 = vmax.f32 %v570_v9, 0.0  ;;  %v645_v14 = vmax.f32 %v610_v10, 0.0  ;;  %v572_v15 = vadd.f32 %v571_v11, %v1337_v53  ;;  %v612_v16 = vadd.f32 %v611_v12, %v1337_v53 }
 0x135   : > { %v573_v17 = vpop.f32.mrf.mxu0  ;;  %v613_v18 = vpop.f32.mrf.mxu1 }
 0x136   : > { %661 = vst [vmem:[%s1347_s9 + $0x68] sm:$0xff] %v629_v13  ;;  %677 = vst [vmem:[%s1347_s9 + $0xe8] sm:$0xff] %v645_v14  ;;  %v630_v19 = vmax.f32 %v572_v15, 0.0  ;;  %v646_v20 = vmax.f32 %v612_v16, 0.0  ;;  %v574_v21 = vadd.f32 %v573_v17, %v1341_v54  ;;  %v614_v22 = vadd.f32 %v613_v18, %v1341_v54 }
 0x138   : > { %662 = vst [vmem:[%s1347_s9 + $0x70] sm:$0xff] %v630_v19  ;;  %678 = vst [vmem:[%s1347_s9 + $0xf0] sm:$0xff] %v646_v20  ;;  %v631_v53 = vmax.f32 %v574_v21, 0.0  ;;  %v647_v23 = vmax.f32 %v614_v22, 0.0 }
 0x13a   : > { %663 = vst [vmem:[%s1347_s9 + $0x78] sm:$0xff] %v631_v53  ;;  %679 = vst [vmem:[%s1347_s9 + $0xf8] sm:$0xff] %v647_v23 }
 0x13b   : > { %1038 = shalt.err (!%p1035_p7)
}
 0x13c   : > { %s1039_s21 = scalar_lea.hbm %s1411_s5, 4096  ;;  %s1043_s28 = scalar_lea.hbm %s1475_s3, 16384 }
 0x13d   : > { %p1040_p9 = scmp.ne.s32.totalorder %s1411_s5, %s1039_s21  ;;  %p1044_p12 = scmp.lt.s32.totalorder %s1411_s5, %s1475_s3 }
 0x13e   : > { %p1045_p13 = scmp.lt.s32.totalorder %s1043_s28, %s1039_s21 }
 0x13f   : > { %p1041_p10 = pnand %p1040_p9, %p1193_p3 }
 0x140   : > { %p1046_p0 = por %p1045_p13, %p1044_p12 }
 0x141   : > { %p1042_p11 = pneg %p1041_p10 }
 0x143   : > { %p1047_p1 = pnand %p1046_p0, %p1042_p11 }
 0x145   : > { %1050 = shalt.err (!%p1047_p1)
}
 0x146   : > { %s1120_s15 = smov 256   ;;  %s1121_s29 = smov 16  }
 0x147   : > { %880 = dma.vmem_to_hbm [thread:$0]  (%p1193_p3), %s1413_s16, 4096, %s1411_s5, %s1421_s7, %s1120_s15, %s1120_s15, %s1121_s29  }
 0x148 PF: > { %p886_p2 = scmp.ge.s32.totalorder %s1117_s19, 2  ;;  %s712_s4 = sand.u32 1, %s1089_s12  }
 0x149   : > { %s713_s8 = scalar_lea.sflag [#allocation3], %s712_s4 }
 0x14a   : > { %p883_p4 = pnand %p886_p2, %p1202_p8 }
 0x14c   : > { %p884_p5 = pneg %p883_p4 }
 0x14e   : > { %1084 = dma.done.wait (%p884_p5), %s713_s8, 4096  }
 0x14f   : > { %1086 = vsyncadd (%p884_p5), %s713_s8, 4294963200  ;;  %s16_s19 = sadd.s32 1, %s1117_s19   ;;  %s1478_s12 = smov %s1093_s13 }
 0x150   : > { %p13_p6 = scmp.ge.s32.totalorder %s16_s19, 6   ;;  %s1479_s13 = smov %s1097_s14 }
 0x151   : > { %s1480_s14 = smov %s1211_s30  ;;  %s1481_s15 = smov %s1109_s17 }
 0x152   : > { %s1482_s16 = smov %s1113_s18  ;;  %s1483_s17 = smov %s1486_s22 }
 0x153   : > { %s1484_s18 = smov %s1490_s23  ;;  %15 = sbr.rel (!%p13_p6) target bundleno = 5 (0x5), region = 67 }
 0x158   :  { %718 = vsyncpa [#allocation3], 1 }
 0x159   :  { %720 = vsyncpa [#allocation3 + $0x1], 1 }

</bundles_post_ra>
